<compile_context>
chip_gen: v7x
topology: tpu7x:2x2x1
jax: 0.10.0
libtpu: 0.0.40
codegen_flags: <defaults>
</compile_context>

<pallas_src>
import jax
import jax.numpy as jnp
from jax import lax
from jax.experimental import pallas as pl
from jax.experimental.pallas import tpu as pltpu


def control_kernel(zero_idx_ref, x_ref, ctrl_ref, o_ref):
    # zero_idx_ref: (B,) int32 in SMEM (scalar prefetch): first column where control applies
    # x_ref:        (1, TS, H)  block-output (hidden states) tile
    # ctrl_ref:     (1, 1, H)   control vector (already scaled by coeff)
    # o_ref:        (1, TS, H)  output tile
    b = pl.program_id(0)
    s = pl.program_id(1)
    ts = x_ref.shape[1]

    x = x_ref[...]                       # input dtype
    c = ctrl_ref[...]                    # (1, 1, H), input dtype

    # Rebuild the (col_index >= zero_index) condition from one SMEM scalar and fold it
    # directly into a select (no int->float cast, no mask multiply).
    row = lax.broadcasted_iota(jnp.int32, (1, ts, 1), 1) + s * ts
    y = jnp.where(row >= zero_idx_ref[b], x + c, x)        # (1, TS, H), input dtype

    # norm_pre^2 / norm_post^2 with f32 accumulation (reductions only, no full f32 tile kept)
    xf = x.astype(jnp.float32)
    yf = y.astype(jnp.float32)
    sum_x2 = jnp.sum(xf * xf, axis=-1, keepdims=True)      # (1, TS, 1) f32
    sum_y2 = jnp.sum(yf * yf, axis=-1, keepdims=True)      # (1, TS, 1) f32

    # out = y / norm_post * norm_pre  ==  y * sqrt(sum_x2) * rsqrt(sum_y2)
    # rsqrt goes to the EUP slot; full-tile multiply stays in the input dtype (bf16 VALU
    # friendly on v6e/v7x), only the (TS,1) scale is computed in f32.
    scale = jnp.sqrt(sum_x2) * lax.rsqrt(sum_y2)            # (1, TS, 1) f32
    o_ref[...] = (y * scale.astype(y.dtype)).astype(o_ref.dtype)


def _tile_and_vmem(S, H, itemsize):
    """Pick a sequence tile and scoped-VMEM request sized for this TPU generation.

    Budget ~5 live (1, TS, H) buffers: x double-buffered + out double-buffered + ctrl/headroom.
    Prefers 512-1024 rows (>=85% of the HBM roofline per measurements); falls back toward 8.
    """
    try:
        vmem_cap = int(pltpu.get_tpu_info().vmem_capacity_bytes)
    except Exception:  # no hardware info available (e.g. interpret mode) -> be conservative
        vmem_cap = 64 * 1024 * 1024  # v7x per-TensorCore VMEM, smallest of the targets
    vmem_limit = min((vmem_cap * 3) // 4, 96 * 1024 * 1024)
    per_block_budget = vmem_limit // 5

    if S <= 8:
        return S, vmem_limit           # full-extent block (allowed even if not 8-aligned)

    ts = 8
    for cand in (1024, 512, 256, 128, 64, 32, 16, 8):
        if cand <= S and cand * H * itemsize <= per_block_budget:
            ts = cand
            break
    return ts, vmem_limit


def apply_control(x, control, zero_indices, *, ts=None, donate=False):
    """x: (B, S, H); control: (H,); zero_indices: (B,) int32. Returns (B, S, H)."""
    B, S, H = x.shape
    itemsize = jnp.dtype(x.dtype).itemsize
    auto_ts, vmem_limit = _tile_and_vmem(S, H, itemsize)
    if ts is None:
        ts = auto_ts

    control = control.reshape(1, 1, H).astype(x.dtype)      # mirrors control.reshape(1, 1, -1)
    zero_indices = zero_indices.astype(jnp.int32)

    # cdiv grid: for non-divisible S the last block's out-of-bounds rows are read as garbage
    # (harmless: per-row math) and their writes are masked out by Pallas.
    grid = (B, pl.cdiv(S, ts))
    # NOTE(v7x): both grid axes are "parallel" so megacore can shard B x ceil(S/ts) steps
    # across the 2 TensorCores; at transformer shapes the step count is comfortably > 2.

    return pl.pallas_call(
        control_kernel,
        out_shape=jax.ShapeDtypeStruct((B, S, H), x.dtype),
        grid_spec=pltpu.PrefetchScalarGridSpec(
            num_scalar_prefetch=1,                           # zero_indices -> SMEM
            grid=grid,
            in_specs=[
                pl.BlockSpec((1, ts, H), lambda b, s, zi: (b, s, 0)),
                pl.BlockSpec((1, 1, H), lambda b, s, zi: (0, 0, 0)),
            ],
            out_specs=pl.BlockSpec((1, ts, H), lambda b, s, zi: (b, s, 0)),
        ),
        compiler_params=pltpu.CompilerParams(
            dimension_semantics=("parallel", "parallel"),
            vmem_limit_bytes=int(vmem_limit),
        ),
        # Optionally reuse x's HBM buffer for the output (caller must no longer need x).
        input_output_aliases=({1: 0} if donate else {}),
    )(zero_indices, x, control)


def zero_indices_from_position_ids(position_ids):
    """Plain-JAX glue reproducing: zero_indices = (pos == 0).cumsum(1).argmax(1)."""
    zero_cumsum = jnp.cumsum((position_ids == 0).astype(jnp.int32), axis=1)
    return jnp.argmax(zero_cumsum, axis=1).astype(jnp.int32)       # (B,)


def control_model_forward(hidden, control, position_ids=None, coeff=1.0):
    """Semantics of ControlModule.forward with normalize=True, operator='+',
    control set to `coeff * control` on the wrapped layer."""
    B, S, H = hidden.shape
    if position_ids is not None:
        zero_indices = zero_indices_from_position_ids(position_ids)
    else:
        # No position_ids branch: modified = modified + control  (mask == 1 everywhere)
        zero_indices = jnp.zeros((B,), dtype=jnp.int32)
    return apply_control(hidden, (coeff * control).astype(hidden.dtype), zero_indices)


def _reference(hidden, control, position_ids, coeff=1.0):
    c = (coeff * control).reshape(1, 1, -1).astype(jnp.float32)
    x = hidden.astype(jnp.float32)
    B, S = position_ids.shape
    zero_indices = zero_indices_from_position_ids(position_ids)[:, None]   # (B, 1)
    col_indices = jnp.arange(S, dtype=jnp.int32)[None, :]                  # (1, S)
    mask = (col_indices >= zero_indices).astype(jnp.float32)[..., None]    # (B, S, 1)
    norm_pre = jnp.linalg.norm(x, axis=-1, keepdims=True)
    y = x + c * mask
    norm_post = jnp.linalg.norm(y, axis=-1, keepdims=True)
    return (y / norm_post * norm_pre).astype(hidden.dtype)


if __name__ == "__main__":
    key = jax.random.PRNGKey(0)
    k_x, k_c, k_x2 = jax.random.split(key, 3)

    # --- small shape matching the module's (batch, seq, hidden) forward ---
    B, S, H = 2, 8, 32
    hidden = jax.random.normal(k_x, (B, S, H), dtype=jnp.float32)
    control = jax.random.normal(k_c, (H,), dtype=jnp.float32)
    position_ids = jnp.stack(
        [
            jnp.arange(S, dtype=jnp.int32),                                   # zero at col 0
            jnp.concatenate([jnp.zeros(3, jnp.int32), jnp.arange(S - 3, dtype=jnp.int32)]),
        ],
        axis=0,
    )

    out = control_model_forward(hidden, control, position_ids=position_ids, coeff=1.0)
    out = jax.block_until_ready(out)
    ref = _reference(hidden, control, position_ids, coeff=1.0)
    assert out.shape == (B, S, H)
    assert jnp.allclose(out, ref, atol=1e-5, rtol=1e-5)

    # --- no-position_ids branch (mask == 1 everywhere) ---
    out2 = jax.block_until_ready(control_model_forward(hidden, control, position_ids=None))
    ref2 = _reference(hidden, control, jnp.ones((B, S), jnp.int32))  # no zeros -> argmax=0 -> all ones
    assert jnp.allclose(out2, ref2, atol=1e-5, rtol=1e-5)

    # --- ragged sequence length (S not a multiple of the tile) exercises the cdiv path ---
    S2 = 20
    hidden2 = jax.random.normal(k_x2, (B, S2, H), dtype=jnp.float32)
    position_ids2 = jnp.stack(
        [
            jnp.arange(S2, dtype=jnp.int32),
            jnp.concatenate([jnp.zeros(5, jnp.int32), jnp.arange(S2 - 5, dtype=jnp.int32)]),
        ],
        axis=0,
    )
    out3 = apply_control(
        hidden2, control, zero_indices_from_position_ids(position_ids2), ts=8
    )
    out3 = jax.block_until_ready(out3)
    ref3 = _reference(hidden2, control, position_ids2, coeff=1.0)
    assert jnp.allclose(out3, ref3, atol=1e-5, rtol=1e-5)

    print("KERNEL_OK")
</pallas_src>

<mosaic_0001>
module attributes {stable_mosaic.version = 11 : i64} {
  func.func @control_kernel(%arg0: i32, %arg1: i32, %arg2: memref<2xi32, #tpu.memory_space<smem>>, %arg3: memref<1x8x32xf32, #tpu.memory_space<vmem>>, %arg4: memref<1x1x32xf32, #tpu.memory_space<vmem>>, %arg5: memref<1x8x32xf32, #tpu.memory_space<vmem>>) attributes {dimension_semantics = [#tpu.dimension_semantics<parallel>, #tpu.dimension_semantics<parallel>], iteration_bounds = array<i64: 2, 1>, scalar_prefetch = 1 : i64, scratch_operands = 0 : i64, tpu.core_type = #tpu.core_type<tc>, window_params = [{transform_indices = @transform_0, window_bounds = array<i64: 1, 8, 32>}, {pipeline_mode = #tpu.pipeline_mode<synchronous>, transform_indices = @transform_1, window_bounds = array<i64: 1, 1, 32>}, {transform_indices = @transform_2, window_bounds = array<i64: 1, 8, 32>}]} {
    %c0 = arith.constant 0 : index
    %c0_0 = arith.constant 0 : index
    %c0_1 = arith.constant 0 : index
    %0 = vector.load %arg3[%c0, %c0_0, %c0_1] : memref<1x8x32xf32, #tpu.memory_space<vmem>>, vector<1x8x32xf32>
    %c0_2 = arith.constant 0 : index
    %c0_3 = arith.constant 0 : index
    %c0_4 = arith.constant 0 : index
    %1 = vector.load %arg4[%c0_2, %c0_3, %c0_4] : memref<1x1x32xf32, #tpu.memory_space<vmem>>, vector<1x1x32xf32>
    %2 = tpu.iota {dimensions = array<i32: 1>} : vector<1x8x1xi32>
    %c8_i32 = arith.constant 8 : i32
    %3 = arith.muli %arg1, %c8_i32 : i32
    %4 = vector.broadcast %3 : i32 to vector<1x8x1xi32>
    %5 = arith.addi %2, %4 : vector<1x8x1xi32>
    %6 = arith.index_cast %arg0 : i32 to index
    %7 = memref.load %arg2[%6] : memref<2xi32, #tpu.memory_space<smem>>
    %8 = vector.broadcast %7 : i32 to vector<1x8x1xi32>
    %9 = arith.cmpi sge, %5, %8 : vector<1x8x1xi32>
    %10 = vector.broadcast %1 : vector<1x1x32xf32> to vector<1x8x32xf32>
    %11 = arith.addf %0, %10 : vector<1x8x32xf32>
    %12 = vector.shape_cast %9 : vector<1x8x1xi1> to vector<1x8x1xi1>
    %13 = vector.broadcast %12 : vector<1x8x1xi1> to vector<1x8x32xi1>
    %14 = arith.select %13, %11, %0 : vector<1x8x32xi1>, vector<1x8x32xf32>
    %15 = arith.mulf %0, %0 : vector<1x8x32xf32>
    %cst = arith.constant dense<0.000000e+00> : vector<1x8xf32>
    %16 = vector.multi_reduction <add>, %15, %cst [2] : vector<1x8x32xf32> to vector<1x8xf32>
    %17 = vector.shape_cast %16 : vector<1x8xf32> to vector<1x8x1xf32>
    %18 = arith.mulf %14, %14 : vector<1x8x32xf32>
    %cst_5 = arith.constant dense<0.000000e+00> : vector<1x8xf32>
    %19 = vector.multi_reduction <add>, %18, %cst_5 [2] : vector<1x8x32xf32> to vector<1x8xf32>
    %20 = vector.shape_cast %19 : vector<1x8xf32> to vector<1x8x1xf32>
    %21 = math.sqrt %17 : vector<1x8x1xf32>
    %22 = math.rsqrt %20 : vector<1x8x1xf32>
    %23 = arith.mulf %21, %22 : vector<1x8x1xf32>
    %24 = vector.broadcast %23 : vector<1x8x1xf32> to vector<1x8x32xf32>
    %25 = arith.mulf %14, %24 : vector<1x8x32xf32>
    %c0_6 = arith.constant 0 : index
    %c0_7 = arith.constant 0 : index
    %c0_8 = arith.constant 0 : index
    %26 = vector.load %arg5[%c0_6, %c0_7, %c0_8] : memref<1x8x32xf32, #tpu.memory_space<vmem>>, vector<1x8x32xf32>
    tpu.vector_store %arg5[%c0_6, %c0_7, %c0_8], %25 {strides = array<i32>} : memref<1x8x32xf32, #tpu.memory_space<vmem>>, vector<1x8x32xf32>,
    return
  }
  func.func @transform_0(%arg0: i32, %arg1: i32, %arg2: memref<2xi32, #tpu.memory_space<smem>>) -> (i32, i32, i32) {
    %c0_i32 = arith.constant 0 : i32
    %c0_i32_0 = arith.constant 0 : i32
    return %arg0, %arg1, %c0_i32 : i32, i32, i32
  }
  func.func @transform_1(%arg0: i32, %arg1: i32, %arg2: memref<2xi32, #tpu.memory_space<smem>>) -> (i32, i32, i32) {
    %c0_i32 = arith.constant 0 : i32
    %c0_i32_0 = arith.constant 0 : i32
    %c0_i32_1 = arith.constant 0 : i32
    %c0_i32_2 = arith.constant 0 : i32
    return %c0_i32, %c0_i32_0, %c0_i32_1 : i32, i32, i32
  }
  func.func @transform_2(%arg0: i32, %arg1: i32, %arg2: memref<2xi32, #tpu.memory_space<smem>>) -> (i32, i32, i32) {
    %c0_i32 = arith.constant 0 : i32
    %c0_i32_0 = arith.constant 0 : i32
    return %arg0, %arg1, %c0_i32 : i32, i32, i32
  }
}

</mosaic_0001>

<bundles_post_ra>
// kernel: tpu_custom_call.1
= control target key start
LH: loop header
LB: loop body
LE: loop exit
PB: predicated region body
PF: predicated region fallthrough
CT: control target
= control target key end

     0   :  { %s741_s0 = inlined_call_operand.hbm [shape: s32[2], index: 0, kind: input, shape index: {}]   ;;  %s742_s1 = inlined_call_operand.hbm [shape: f32[2,8,32], index: 1, kind: input, shape index: {}]   ;;  %s743_s2 = inlined_call_operand.vmem [shape: f32[1,1,32], index: 2, kind: input, shape index: {}]   ;;  %s744_s3 = inlined_call_operand.hbm [shape: f32[2,8,32], index: 3, kind: output, shape index: {}]  }
   0x1   :  { %s397_s14 = scalar_lea.hbm %s741_s0, 16 }
   0x2   :  { %p398_p0 = scmp.ne.s32.totalorder %s741_s0, %s397_s14  ;;  %p401_p1 = scmp.lt.u32.totalorder %s397_s14, %s741_s0 }
   0x4   :  { %p403_p2 = pnand %p401_p1, %p398_p0 }
   0x6   :  { %406 = shalt.err (!%p403_p2)  }
   0x7   :  { %s523_s19 = smov [#allocation3]  }
   0x8   :  { %9 = dma.hbm_to_smem %s741_s0, 16, %s523_s19, [#allocation2] }
   0x9   :  { %489 = dma.done.wait [#allocation2], 16 }
   0xa   :  { %490 = vsyncadd [#allocation2], 4294967280 }
   0xb   :  { %11 = sfence }
   0xc   :  { %12 = vsyncpa [#allocation5], 0 }
   0xd   :  { %14 = vsyncpa [#allocation5 + $0x1], 0 }
   0xe   :  { %15 = vsyncpa [#allocation6], 0 }
   0xf   :  { %17 = vsyncpa [#allocation6 + $0x1], 0  ;;  %s558_s22 = smov 0   ;;  %s560_s23 = smov 0  }
  0x10   :  { %s562_s24 = smov 0   ;;  %s564_s25 = smov 0  }
  0x11   :  { %s566_s26 = smov 0   ;;  %s568_s27 = smov 0  }
  0x12 LB: > { %s316_s0 = sadd.s32 4294967295, %s521_s27   ;;  %s317_s28 = sadd.s32 4294967294, %s521_s27   ;;  %s521_s27 = sphi %s568_s27, %s23_s27   ;;  %s517_s26 = sphi %s566_s26, %s760_s26   ;;  %s513_s25 = sphi %s564_s25, %s759_s25   ;;  %s509_s24 = sphi %s562_s24, %s758_s24   ;;  %s505_s23 = sphi %s560_s23, %s757_s23   ;;  %s501_s22 = sphi %s558_s22, %s756_s22  }
  0x13   : > { %s35_s29 = sadd.s32 1, %s517_s26  ;;  %s44_s30 = sadd.s32 1, %s509_s24 }
  0x14   : > { %p37_p3 = scmp.ge.s32.totalorder %s35_s29, 2  ;;  %p51_p4 = scmp.ne.s32.totalorder %s509_s24, %s505_s23 }
  0x15   : > { %p52_p5 = scmp.eq.s32.totalorder %s521_s27, 0  ;;  %p57_p6 = scmp.ne.s32.totalorder %s505_s23, %s501_s22 }
  0x16   : > { %s762_s29 = smov (%p37_p3, %s35_s29), 0  ;;  %p58_p8 = scmp.eq.s32.totalorder %s316_s0, 0 }
  0x17   : > { %p599_p7 = por %p52_p5, %p51_p4  ;;  %s39_s5 = ssub.s32 %s517_s26, %s762_s29 }
  0x18   : > { %p104_p9 = scmp.eq.s32.totalorder %s316_s0, 1  ;;  %p42_p10 = scmp.eq.s32.totalorder %s39_s5, 0 }
  0x19   : > { %p605_p11 = por %p58_p8, %p57_p6  ;;  %p110_p13 = scmp.eq.s32.totalorder %s317_s28, 1 }
  0x1a   : > { %p609_p12 = por %p104_p9, %p51_p4  ;;  %p342_p2 = scmp.lt.s32.totalorder %s521_s27, 2 }
  0x1b   : > { %s614_s8 = scalar_select %p42_p10, %s509_s24, %s44_s30  }
  0x1c   : > { %s748_s7 = scalar_select %p609_p12, 1, 0 }
  0x1d   : > { %p616_p0 = por %p110_p13, %p57_p6  ;;  %s133_s10 = sand.u32 1, %s509_s24  }
  0x1e   : > { %s320_s11 = sshll.u32 %s133_s10, 3  ;;  %s321_s12 = sshll.u32 %s517_s26, 7 }
  0x1f   : > { %s749_s9 = scalar_select %p616_p0, 1, 0 }
  0x20   : > { %s627_s15 = scalar_lea.hbm %s742_s1, %s321_s12  ;;  %s137_s16 = scalar_lea.vmem [#allocation4], %s320_s11 }
  0x21   : > { %s145_s17 = sshll.u32 %s137_s16, 4  ;;  %p633_p3 = pnand %p342_p2, %p599_p7  ;;  %s629_s17 = int_to_ptr.vmem [resolvable:$true] %s145_s17 }
  0x22   : > { %s134_s19 = scalar_lea.sflag [#allocation5], %s133_s10  ;;  %s407_s20 = scalar_lea.hbm %s627_s15, 128 }
  0x23   : > { %p408_p6 = scmp.ne.s32.totalorder %s627_s15, %s407_s20  ;;  %p409_p8 = pneg %p633_p3 }
  0x24   : > { %s412_s28 = scalar_lea.hbm %s742_s1, 256  ;;  %p413_p7 = scmp.lt.u32.totalorder %s627_s15, %s742_s1 }
  0x25   : > { %p410_p9 = pnand %p409_p8, %p408_p6  ;;  %p414_p13 = scmp.lt.u32.totalorder %s412_s28, %s407_s20 }
  0x26   : > { %p416_p1 = scmp.lt.u32.totalorder %s407_s20, %s627_s15 }
  0x27   : > { %p411_p10 = pneg %p410_p9  ;;  %p415_p2 = por %p414_p13, %p413_p7 }
  0x29   : > { %p417_p4 = por %p416_p1, %p415_p2 }
  0x2b   : > { %p418_p5 = pnand %p417_p4, %p411_p10 }
  0x2d   : > { %421 = shalt.err (!%p418_p5)
}
  0x2e   : > { %s422_s5 = scalar_lea.vmem %s629_s17, 128  ;;  %s524_s10 = smov [#allocation4]  }
  0x2f   : > { %p423_p6 = scmp.ne.s32.totalorder %s629_s17, %s422_s5  ;;  %s427_s11 = sshll.u32 %s524_s10, 4  ;;  %s428_s11 = int_to_ptr.vmem [resolvable:$false] %s427_s11 }
  0x30   : > { %s429_s12 = scalar_lea.vmem %s428_s11, 256  ;;  %p430_p12 = scmp.lt.s32.totalorder %s629_s17, %s428_s11 }
  0x31   : > { %p425_p9 = pnand %p423_p6, %p409_p8  ;;  %p431_p7 = scmp.lt.s32.totalorder %s429_s12, %s422_s5 }
  0x33   : > { %p426_p0 = pneg %p425_p9  ;;  %p432_p13 = por %p431_p7, %p430_p12 }
  0x35   : > { %p433_p1 = pnand %p432_p13, %p426_p0 }
  0x37   : > { %436 = shalt.err (!%p433_p1)
}
  0x38   : > { %337 = dma.hbm_to_vmem [thread:$0]  (!%p633_p3), %s627_s15, 128, %s629_s17, %s134_s19  }
  0x39   : > { %p751_p4 = scmp.lt.s32.totalorder %s521_s27, 3  ;;  %p752_p5 = scmp.ge.s32.totalorder %s521_s27, 1 }
  0x3b   : > { %p151_p8 = pnand %p752_p5, %p751_p4 }
  0x3c   : > { %s669_s13 = sand.u32 (!%p151_p8), 1, %s505_s23  }
  0x3d   : > { %154 = sbr.rel (%p151_p8) target bundleno = 252 (0xfc), region = 28  ;;  %s323_s14 = sshll.u32 (!%p151_p8), %s669_s13, 3 }
  0x3e   : > { %s157_s16 = scalar_lea.sflag (!%p151_p8), [#allocation5], %s669_s13  ;;  %s160_s18 = scalar_lea.vmem (!%p151_p8), [#allocation4], %s323_s14 }
  0x44   : > { %492 = dma.done.wait (%p605_p11), %s157_s16, 128  }
  0x45   : > { %494 = vsyncadd (%p605_p11), %s157_s16, 4294967168  ;;  %v183_v0 = vlaneseq  ;;  %s188_s15 = sld [smem:[#allocation3 + %s513_s25]]  ;;  %v181_v2 = vld [vmem:[%s160_s18] sm:$0xff]  ;;  %vm202_vm0 = vcmask 261120   ;;  %s327_s6 = sshll.u32 %s513_s25, 7 }
  0x46   : > { %v325_v3 = vld [vmem:[%s743_s2] ss:$0 sm:$0xff]  ;;  %v201_v5 = vmul.f32 %v181_v2, %v181_v2  ;;  %s180_s20 = scalar_lea.vmem [#allocation7], %s323_s14  ;;  %s691_s30 = scalar_lea.hbm %s744_s3, %s327_s6 }
  0x47   : > { %v184_v1 = vshrl.u32 %v183_v0, 7  ;;  %v197_v6 = vadd.f32 %v325_v3, %v181_v2  ;;  %s236_s21 = sshll.u32 %s180_s20, 4  ;;  %s222_s4 = scalar_lea.sflag [#allocation6], %s669_s13  ;;  %s693_s21 = int_to_ptr.vmem [resolvable:$true] %s236_s21 }
  0x48   : > { %v203_v7 = vsel %vm202_vm0, %v201_v5, 0.0  ;;  %s437_s5 = scalar_lea.vmem %s693_s21, 128  ;;  %p753_p12 = scmp.ne.s32.totalorder %s748_s7, 0 }
  0x49   : > { %204 = vadd.xlane.f32.xlu0 %v203_v7  ;;  %p438_p11 = scmp.ne.s32.totalorder %s693_s21, %s437_s5  ;;  %s525_s25 = smov [#allocation7]  }
  0x4a   : > { %s441_s10 = sshll.u32 %s525_s25, 4  ;;  %s442_s10 = int_to_ptr.vmem [resolvable:$false] %s441_s10 }
  0x4b   : > { %v189_v4 = vstv %s188_s15  ;;  %p439_p0 = pnand %p438_p11, %p753_p12  ;;  %s443_s11 = scalar_lea.vmem %s442_s10, 256 }
  0x4c   : > { %vm190_vm1 = vcmp.ge.s32.totalorder %v184_v1, %v189_v4  ;;  %p444_p10 = scmp.lt.s32.totalorder %s693_s21, %s442_s10  ;;  %p445_p2 = scmp.lt.s32.totalorder %s443_s11, %s437_s5 }
  0x4d   : > { %v200_v8 = vsel %vm190_vm1, %v197_v6, %v181_v2  ;;  %p440_p3 = pneg %p439_p0 }
  0x4e   : > { %v206_v9 = vmul.f32 %v200_v8, %v200_v8  ;;  %p446_p6 = por %p445_p2, %p444_p10 }
  0x50   : > { %v207_v10 = vsel %vm202_vm0, %v206_v9, 0.0  ;;  %p447_p9 = pnand %p446_p6, %p440_p3 }
  0x51   : > { %208 = vadd.xlane.f32.xlu0 %v207_v10 }
  0xd6   : > { %v205_v11 = vpop.xlane.xlu0 %204 }
  0xd7   : > { %393 = vrsqrt.f32 %v205_v11  ;;  %vm212_vm2 = vcmp.eq.f32.partialorder %v205_v11, inf  ;;  %v215_v15 = vand.u32 2147483648, %v205_v11  ;;  %vm214_vm3 = vcmp.eq.f32.partialorder %v205_v11, 0.0 }
  0xde   : > { %v209_v12 = vpop.xlane.xlu0 %208 }
  0xdf   : > { %395 = vrsqrt.f32 %v209_v12 }
  0xe1   : > { %v394_v13 = vpop.eup %393 }
  0xe2   : > { %v211_v14 = vmul.f32 %v394_v13, %v205_v11 }
  0xe4   : > { %v213_v16 = vsel %vm212_vm2, %v205_v11, %v211_v14 }
  0xe5   : > { %v216_v18 = vsel %vm214_vm3, %v215_v15, %v213_v16 }
  0xe9   : > { %v396_v17 = vpop.eup %395 }
  0xea   : > { %v218_v19 = vmul.f32 %v396_v17, %v216_v18 }
  0xec   : > { %v219_v20 = vmul.f32 %v218_v19, %v200_v8 }
  0xee   : > { %220 = vst.msk [vmem:[%s180_s20] sm:$0xff] %vm202_vm0, %v219_v20 }
  0xef   : > { %450 = shalt.err (!%p447_p9)
}
  0xf0   : > { %s451_s12 = scalar_lea.hbm %s691_s30, 128  ;;  %s455_s16 = scalar_lea.hbm %s744_s3, 256 }
  0xf1   : > { %p452_p7 = scmp.ne.s32.totalorder %s691_s30, %s451_s12  ;;  %p456_p4 = scmp.lt.u32.totalorder %s691_s30, %s744_s3 }
  0xf2   : > { %p457_p5 = scmp.lt.u32.totalorder %s455_s16, %s451_s12  ;;  %p459_p11 = scmp.lt.u32.totalorder %s451_s12, %s691_s30 }
  0xf3   : > { %p453_p13 = pnand %p452_p7, %p753_p12 }
  0xf4   : > { %p458_p8 = por %p457_p5, %p456_p4 }
  0xf5   : > { %p454_p1 = pneg %p453_p13 }
  0xf6   : > { %p460_p0 = por %p459_p11, %p458_p8 }
  0xf8   : > { %p461_p3 = pnand %p460_p0, %p454_p1 }
  0xfa   : > { %464 = shalt.err (!%p461_p3)
}
  0xfb   : > { %332 = dma.vmem_to_hbm [thread:$0]  (%p753_p12), %s693_s21, 128, %s691_s30, %s222_s4  }
  0xfc PF: > { %s248_s17 = sand.u32 1, %s501_s22   ;;  %p754_p10 = scmp.ne.s32.totalorder %s749_s9, 0 }
  0xfd   : > { %p755_p2 = scmp.ge.s32.totalorder %s521_s27, 2  ;;  %s249_s19 = scalar_lea.sflag [#allocation6], %s248_s17 }
  0xff   : > { %p339_p6 = pnand %p755_p2, %p754_p10 }
 0x101   : > { %496 = dma.done.wait (!%p339_p6), %s249_s19, 128  }
 0x102   : > { %498 = vsyncadd (!%p339_p6), %s249_s19, 4294967168  ;;  %s23_s27 = sadd.s32 1, %s521_s27   ;;  %s756_s22 = smov %s505_s23 }
 0x103   : > { %p20_p9 = scmp.ge.s32.totalorder %s23_s27, 4   ;;  %s757_s23 = smov %s509_s24 }
 0x104   : > { %s758_s24 = smov %s614_s8  ;;  %s759_s25 = smov %s517_s26 }
 0x105   : > { %s760_s26 = smov %s762_s29  ;;  %22 = sbr.rel (!%p20_p9) target bundleno = 18 (0x12), region = 73 }
 0x10c   :  { %254 = vsyncpa [#allocation5], 1 }
 0x10d   :  { %256 = vsyncpa [#allocation5 + $0x1], 1 }
 0x10e   :  { %257 = vsyncpa [#allocation6], 1 }
 0x10f   :  { %259 = vsyncpa [#allocation6 + $0x1], 1 }

</bundles_post_ra>
